<compile_context>
chip_gen: v7x
topology: tpu7x:2x2x1
jax: 0.10.0
libtpu: 0.0.40
codegen_flags: <defaults>
</compile_context>

<pallas_src>
import jax
import jax.numpy as jnp
from jax import lax
from jax.experimental import pallas as pl
from jax.experimental.pallas import tpu as pltpu

_LANE = 128            # TPU lane width: keeps every store an unmasked vst
_MAX_TILE_ROWS = 512   # large tiles ~= 85% of HBM roofline; 512*128*4B = 256 KiB/buffer


def _uniform_kernel(seed_ref, out_ref):
    """Fill one (tile_rows, 128) tile with uniform float32 values in [0, 1)."""
    tile_rows, lane = out_ref.shape
    pid = pl.program_id(0)

    # Global element index of every entry of this tile (unique per tile, so
    # every grid step / TensorCore draws an independent stream).
    row = lax.broadcasted_iota(jnp.int32, (tile_rows, lane), 0).astype(jnp.uint32)
    col = lax.broadcasted_iota(jnp.int32, (tile_rows, lane), 1).astype(jnp.uint32)
    base = (pid * (tile_rows * lane)).astype(jnp.uint32)
    idx = base + row * jnp.uint32(lane) + col

    # splitmix32-style finalizer keyed by the seed.
    seed = seed_ref[0].astype(jnp.uint32)
    x = idx + seed * jnp.uint32(0x9E3779B9)
    x = x ^ (x >> 16)
    x = x * jnp.uint32(0x7FEB352D)
    x = x ^ (x >> 15)
    x = x * jnp.uint32(0x846CA68B)
    x = x ^ (x >> 16)

    # Keep top 23 bits as mantissa, force exponent to 127 -> value in [1, 2),
    # subtract 1.0 -> uniform in [0, 1).
    mantissa = (x >> 9) | jnp.uint32(0x3F800000)
    out_ref[...] = lax.bitcast_convert_type(mantissa, jnp.float32) - 1.0


def my_backbone_forward(x, seed=0):
    """Pallas equivalent of MyBackbone.forward (three torch.rand outputs)."""
    B, C, H, W = x.shape
    Hh, Wh = H // 2, W // 2

    n1 = B * 4 * Hh * Wh
    n2 = B * 8 * Hh * Wh
    n3 = B * 16 * Hh * Wh
    total = n1 + n2 + n3

    # One fused lane-dense slab covering all three outputs (padded up).
    rows = -(-total // _LANE)            # ceil-div to full 128-lane rows
    rows = ((rows + 7) // 8) * 8         # sublane multiple of 8
    tile_rows = min(_MAX_TILE_ROWS, rows)
    grid = -(-rows // tile_rows)
    rows = grid * tile_rows              # pad so the grid divides evenly

    seed_arr = jnp.array([seed], dtype=jnp.int32)

    slab = pl.pallas_call(
        _uniform_kernel,
        out_shape=jax.ShapeDtypeStruct((rows, _LANE), jnp.float32),
        grid=(grid,),
        in_specs=[pl.BlockSpec(memory_space=pltpu.MemorySpace.SMEM)],
        out_specs=pl.BlockSpec((tile_rows, _LANE), lambda i: (i, 0)),
        compiler_params=pltpu.CompilerParams(
            dimension_semantics=("parallel",)),
    )(seed_arr)

    flat = slab.reshape(-1)[:total]
    o1 = flat[:n1].reshape(B, 4, Hh, Wh)
    o2 = flat[n1:n1 + n2].reshape(B, 8, Hh, Wh)
    o3 = flat[n1 + n2:].reshape(B, 16, Hh, Wh)
    return o1, o2, o3


if __name__ == "__main__":
    key = jax.random.PRNGKey(0)
    # Small NCHW input consistent with the module's forward signature.
    x = jax.random.normal(key, (2, 4, 16, 16), dtype=jnp.float32)

    outs = my_backbone_forward(x, seed=0)
    outs = jax.block_until_ready(outs)

    B, C, H, W = x.shape
    expected_shapes = [
        (B, 4, H // 2, W // 2),
        (B, 8, H // 2, W // 2),
        (B, 16, H // 2, W // 2),
    ]
    for o, es in zip(outs, expected_shapes):
        assert o.shape == es, (o.shape, es)
        assert o.dtype == jnp.float32
        assert bool(jnp.all(o >= 0.0)) and bool(jnp.all(o < 1.0))

    # Sanity: different seeds give different draws; same seed is deterministic.
    outs_b = jax.block_until_ready(my_backbone_forward(x, seed=1))
    assert not bool(jnp.allclose(outs[0], outs_b[0]))
    outs_c = jax.block_until_ready(my_backbone_forward(x, seed=0))
    assert bool(jnp.array_equal(outs[0], outs_c[0]))

    print("KERNEL_OK")
</pallas_src>

<mosaic_0001>
module attributes {stable_mosaic.version = 11 : i64} {
  func.func @_uniform_kernel(%arg0: i32, %arg1: memref<1xi32, #tpu.memory_space<smem>>, %arg2: memref<32x128xf32, #tpu.memory_space<vmem>>) attributes {dimension_semantics = [#tpu.dimension_semantics<parallel>], iteration_bounds = array<i64: 1>, scalar_prefetch = 0 : i64, scratch_operands = 0 : i64, tpu.core_type = #tpu.core_type<tc>, window_params = [{transform_indices = @transform_0, window_bounds = array<i64: 1>}, {transform_indices = @transform_1, window_bounds = array<i64: 32, 128>}]} {
    %0 = tpu.iota {dimensions = array<i32: 0>} : vector<32x128xi32>
    %1 = tpu.iota {dimensions = array<i32: 1>} : vector<32x128xi32>
    %c4096_i32 = arith.constant 4096 : i32
    %2 = arith.muli %arg0, %c4096_i32 : i32
    %c128_i32 = arith.constant 128 : i32
    %3 = vector.broadcast %c128_i32 : i32 to vector<32x128xi32>
    %4 = arith.muli %0, %3 : vector<32x128xi32>
    %5 = vector.broadcast %2 : i32 to vector<32x128xi32>
    %6 = arith.addi %5, %4 : vector<32x128xi32>
    %7 = arith.addi %6, %1 : vector<32x128xi32>
    %c0 = arith.constant 0 : index
    %8 = memref.load %arg1[%c0] : memref<1xi32, #tpu.memory_space<smem>>
    %c-1640531527_i32 = arith.constant -1640531527 : i32
    %9 = arith.muli %8, %c-1640531527_i32 : i32
    %10 = vector.broadcast %9 : i32 to vector<32x128xi32>
    %11 = arith.addi %7, %10 : vector<32x128xi32>
    %c16_i32 = arith.constant 16 : i32
    %12 = vector.broadcast %c16_i32 : i32 to vector<32x128xi32>
    %13 = arith.shrui %11, %12 : vector<32x128xi32>
    %14 = arith.xori %11, %13 : vector<32x128xi32>
    %c2146121005_i32 = arith.constant 2146121005 : i32
    %15 = vector.broadcast %c2146121005_i32 : i32 to vector<32x128xi32>
    %16 = arith.muli %14, %15 : vector<32x128xi32>
    %c15_i32 = arith.constant 15 : i32
    %17 = vector.broadcast %c15_i32 : i32 to vector<32x128xi32>
    %18 = arith.shrui %16, %17 : vector<32x128xi32>
    %19 = arith.xori %16, %18 : vector<32x128xi32>
    %c-2073254261_i32 = arith.constant -2073254261 : i32
    %20 = vector.broadcast %c-2073254261_i32 : i32 to vector<32x128xi32>
    %21 = arith.muli %19, %20 : vector<32x128xi32>
    %c16_i32_0 = arith.constant 16 : i32
    %22 = vector.broadcast %c16_i32_0 : i32 to vector<32x128xi32>
    %23 = arith.shrui %21, %22 : vector<32x128xi32>
    %24 = arith.xori %21, %23 : vector<32x128xi32>
    %c9_i32 = arith.constant 9 : i32
    %25 = vector.broadcast %c9_i32 : i32 to vector<32x128xi32>
    %26 = arith.shrui %24, %25 : vector<32x128xi32>
    %c1065353216_i32 = arith.constant 1065353216 : i32
    %27 = vector.broadcast %c1065353216_i32 : i32 to vector<32x128xi32>
    %28 = arith.ori %26, %27 : vector<32x128xi32>
    %29 = tpu.bitcast %28 : vector<32x128xi32> -> vector<32x128xf32>
    %cst = arith.constant 1.000000e+00 : f32
    %30 = vector.broadcast %cst : f32 to vector<32x128xf32>
    %31 = arith.subf %29, %30 : vector<32x128xf32>
    %c0_1 = arith.constant 0 : index
    %c0_2 = arith.constant 0 : index
    %32 = vector.load %arg2[%c0_1, %c0_2] : memref<32x128xf32, #tpu.memory_space<vmem>>, vector<32x128xf32>
    tpu.vector_store %arg2[%c0_1, %c0_2], %31 {strides = array<i32>} : memref<32x128xf32, #tpu.memory_space<vmem>>, vector<32x128xf32>,
    return
  }
  func.func @transform_0(%arg0: i32) -> i32 {
    %c0_i32 = arith.constant 0 : i32
    %c0_i32_0 = arith.constant 0 : i32
    return %c0_i32 : i32
  }
  func.func @transform_1(%arg0: i32) -> (i32, i32) {
    %c0_i32 = arith.constant 0 : i32
    %c0_i32_0 = arith.constant 0 : i32
    return %arg0, %c0_i32 : i32, i32
  }
}

</mosaic_0001>

<bundles_post_ra>
// kernel: tpu_custom_call.1
= control target key start
LH: loop header
LB: loop body
LE: loop exit
PB: predicated region body
PF: predicated region fallthrough
CT: control target
= control target key end

     0   :  { %v10_v0 = vlaneseq  ;;  %s165_s0 = inlined_call_operand.<no memory space> [shape: s32[1], index: 0, kind: input, shape index: {}]   ;;  %s166_s1 = inlined_call_operand.hbm [shape: f32[32,128], index: 1, kind: output, shape index: {}]  }
   0x1   :  { %7 = vsyncpa [#allocation4], 0  ;;  %s32_s8 = smul.u32 2654435769, %s165_s0  ;;  %s137_s0 = smov [#allocation3]  }
   0x2   :  { %v11_v1 = vshrl.u32 %v10_v0, 7  ;;  %v16_v2 = vand.u32 127, %v10_v0  ;;  %s95_s9 = sshll.u32 %s137_s0, 4  ;;  %s96_s9 = int_to_ptr.vmem [resolvable:$true] %s95_s9 }
   0x3   :  { %v33_v7 = vstv %s32_s8  ;;  %s113_s10 = scalar_lea.vmem %s96_s9, 512  ;;  %p118_p1 = scmp.lt.s32.totalorder %s96_s9, %s96_s9 }
   0x4   :  { %v18_v3 = vmul.u32 128, %v11_v1  ;;  %v12_v4 = vadd.s32 8, %v11_v1  ;;  %v13_v5 = vadd.s32 16, %v11_v1  ;;  %v14_v6 = vadd.s32 24, %v11_v1  ;;  %p114_p0 = scmp.ne.s32.totalorder %s96_s9, %s113_s10  ;;  %p119_p2 = scmp.lt.s32.totalorder %s113_s10, %s113_s10 }
   0x6   :  { %v27_v8 = vadd.s32 %v18_v3, %v16_v2  ;;  %v19_v9 = vmul.u32 128, %v12_v4  ;;  %v20_v10 = vmul.u32 128, %v13_v5  ;;  %p120_p3 = por %p119_p2, %p118_p1 }
   0x7   :  { %v21_v11 = vmul.u32 128, %v14_v6 }
   0x8   :  { %v34_v12 = vadd.s32 %v33_v7, %v27_v8  ;;  %v28_v13 = vadd.s32 %v19_v9, %v16_v2  ;;  %v29_v14 = vadd.s32 %v20_v10, %v16_v2  ;;  %p121_p4 = pnand %p120_p3, %p114_p0 }
   0x9   :  { %v30_v15 = vadd.s32 %v21_v11, %v16_v2 }
   0xa   :  { %v38_v16 = vshrl.u32 %v34_v12, 16  ;;  %v35_v17 = vadd.s32 %v33_v7, %v28_v13  ;;  %v36_v18 = vadd.s32 %v33_v7, %v29_v14 }
   0xb   :  { %v37_v19 = vadd.s32 %v33_v7, %v30_v15 }
   0xc   :  { %v42_v20 = vxor.u32 %v38_v16, %v34_v12  ;;  %v39_v21 = vshrl.u32 %v35_v17, 16  ;;  %v40_v22 = vshrl.u32 %v36_v18, 16 }
   0xd   :  { %v41_v23 = vshrl.u32 %v37_v19, 16 }
   0xe   :  { %v46_v24 = vmul.u32 2146121005, %v42_v20  ;;  %v43_v25 = vxor.u32 %v39_v21, %v35_v17  ;;  %v44_v26 = vxor.u32 %v40_v22, %v36_v18 }
   0xf   :  { %v45_v27 = vxor.u32 %v41_v23, %v37_v19 }
  0x10   :  { %v50_v28 = vshrl.u32 %v46_v24, 15  ;;  %v47_v29 = vmul.u32 2146121005, %v43_v25  ;;  %v48_v30 = vmul.u32 2146121005, %v44_v26 }
  0x11   :  { %v49_v31 = vmul.u32 2146121005, %v45_v27 }
  0x12   :  { %v54_v32 = vxor.u32 %v50_v28, %v46_v24  ;;  %v51_v33 = vshrl.u32 %v47_v29, 15  ;;  %v52_v34 = vshrl.u32 %v48_v30, 15 }
  0x13   :  { %v53_v35 = vshrl.u32 %v49_v31, 15 }
  0x14   :  { %v58_v36 = vmul.u32 2221713035, %v54_v32  ;;  %v55_v37 = vxor.u32 %v51_v33, %v47_v29  ;;  %v56_v38 = vxor.u32 %v52_v34, %v48_v30 }
  0x15   :  { %v57_v39 = vxor.u32 %v53_v35, %v49_v31 }
  0x16   :  { %v62_v40 = vshrl.u32 %v58_v36, 16  ;;  %v59_v41 = vmul.u32 2221713035, %v55_v37  ;;  %v60_v42 = vmul.u32 2221713035, %v56_v38 }
  0x17   :  { %v61_v43 = vmul.u32 2221713035, %v57_v39 }
  0x18   :  { %v66_v44 = vxor.u32 %v62_v40, %v58_v36  ;;  %v63_v45 = vshrl.u32 %v59_v41, 16  ;;  %v64_v46 = vshrl.u32 %v60_v42, 16 }
  0x19   :  { %v65_v47 = vshrl.u32 %v61_v43, 16 }
  0x1a   :  { %v70_v48 = vshrl.u32 %v66_v44, 9  ;;  %v67_v49 = vxor.u32 %v63_v45, %v59_v41  ;;  %v68_v50 = vxor.u32 %v64_v46, %v60_v42 }
  0x1b   :  { %v69_v51 = vxor.u32 %v65_v47, %v61_v43 }
  0x1c   :  { %v74_v52 = vor.u32 1065353216, %v70_v48  ;;  %v71_v53 = vshrl.u32 %v67_v49, 9  ;;  %v72_v54 = vshrl.u32 %v68_v50, 9 }
  0x1d   :  { %v73_v55 = vshrl.u32 %v69_v51, 9 }
  0x1e   :  { %v106_v56 = vadd.f32 -1.0, %v74_v52  ;;  %v75_v57 = vor.u32 1065353216, %v71_v53  ;;  %v76_v58 = vor.u32 1065353216, %v72_v54 }
  0x1f   :  { %v77_v59 = vor.u32 1065353216, %v73_v55 }
  0x20   :  { %86 = vst [vmem:[#allocation3] sm:$0xff] %v106_v56  ;;  %v107_v60 = vadd.f32 -1.0, %v75_v57  ;;  %v108_v61 = vadd.f32 -1.0, %v76_v58 }
  0x21   :  { %v109_v62 = vadd.f32 -1.0, %v77_v59 }
  0x22   :  { %87 = vst [vmem:[#allocation3 + $0x8] sm:$0xff] %v107_v60  ;;  %88 = vst [vmem:[#allocation3 + $0x10] sm:$0xff] %v108_v61 }
  0x23   :  { %89 = vst [vmem:[#allocation3 + $0x18] sm:$0xff] %v109_v62 }
  0x24   :  { %124 = shalt.err (!%p121_p4)
}
  0x25   :  { %s125_s13 = scalar_lea.hbm %s166_s1, 512 }
  0x26   :  { %p126_p5 = scmp.ne.s32.totalorder %s166_s1, %s125_s13  ;;  %p129_p6 = scmp.lt.u32.totalorder %s125_s13, %s166_s1 }
  0x28   :  { %p131_p7 = pnand %p129_p6, %p126_p5 }
  0x2a   :  { %134 = shalt.err (!%p131_p7)
}
  0x2b   :  { %s138_s18 = smov 128   ;;  %s139_s19 = smov 8  }
  0x2c   :  { %101 = dma.vmem_to_hbm [thread:$0]  %s96_s9, 512, %s166_s1, [#allocation4], %s138_s18, %s138_s18, %s139_s19  }
  0x2d   :  { %135 = dma.done.wait [#allocation4], 512  }
  0x2e   :  { %136 = vsyncadd [#allocation4], 4294966784 }
  0x2f   :  { %105 = vsyncpa [#allocation4], 1 }

</bundles_post_ra>
